<compile_context>
chip_gen: v7x
topology: tpu7x:2x2x1
jax: 0.10.0
libtpu: 0.0.40
codegen_flags: <defaults>
</compile_context>

<pallas_src>
import functools

import jax
import jax.numpy as jnp
from jax import lax
from jax.experimental import pallas as pl
from jax.experimental.pallas import tpu as pltpu


# ----------------------------- helpers ---------------------------------------
def _round_up(v, m):
    return ((v + m - 1) // m) * m


# Fused (in-kernel one-hot gather) path is only profitable / VMEM-safe for small tables.
_FUSED_MAX_NODES = 512
_FUSED_MAX_RELATIONS = 512
_FUSED_TILE = 512


# ----------------------------- Pallas kernels --------------------------------
def _dedicom_fused_kernel(idx_ref, xT_ref, lvT_ref, gT_ref, out_ref):
    """One tile of edges; row gathers done in-kernel via bounded one-hot matmuls.

    idx_ref : (3, TE) int32   rows = [relation id, left node, right node]
    xT_ref  : (D, N)  f32     node features (transposed), VMEM-resident
    lvT_ref : (D, R)  f32     local_variation (transposed), VMEM-resident
    gT_ref  : (D, D)  f32     global_interaction^T, VMEM-resident
    out_ref : (1, TE) f32     sigmoid(scores), lane-dense
    """
    te = out_ref.shape[1]
    d_dim, n_nodes = xT_ref.shape
    n_rel = lvT_ref.shape[1]

    ids = idx_ref[...]                                   # (3, TE) int32
    et = ids[0:1, :]                                     # (1, TE)
    # Left/right ids concatenated on the lane axis so both node gathers become ONE matmul.
    lr = jnp.concatenate([ids[1:2, :], ids[2:3, :]], axis=1)   # (1, 2*TE)

    # One-hot column selectors applied via MXU matmuls (bounded by the fused-path gate).
    node_iota = lax.broadcasted_iota(jnp.int32, (n_nodes, 2 * te), 0)
    oh_lr = (node_iota == lr).astype(jnp.float32)        # (N, 2*TE)
    rel_iota = lax.broadcasted_iota(jnp.int32, (n_rel, te), 0)
    oh_d = (rel_iota == et).astype(jnp.float32)          # (R, TE)

    xlr = jnp.dot(xT_ref[...], oh_lr, preferred_element_type=jnp.float32)   # (D, 2*TE)
    dT = jnp.dot(lvT_ref[...], oh_d, preferred_element_type=jnp.float32)    # (D, TE)
    xlT = xlr[:, :te]
    xrT = xlr[:, te:]

    a = xlT * dT                                                            # (D, TE)  VPU
    b = jnp.dot(gT_ref[...], a, preferred_element_type=jnp.float32)         # (D, TE)  MXU
    s = jnp.sum(b * dT * xrT, axis=0, keepdims=True)                        # (1, TE)  sublane reduce
    out_ref[...] = jax.nn.sigmoid(s)


def _dedicom_streaming_kernel(xl_ref, xr_ref, dv_ref, g_ref, out_ref):
    """One tile of edges with pre-gathered (TILE, D) operands (general / large-graph path).

    xl_ref, xr_ref, dv_ref : (TILE, D) f32  gathered node rows / relation diagonals
    g_ref                  : (D, D)    f32  global_interaction (VMEM-resident)
    out_ref                : (TILE, 1) f32  sigmoid(scores)
    """
    dv = dv_ref[...]
    a = xl_ref[...] * dv                                                     # (TILE, D)
    b = jnp.dot(a, g_ref[...], preferred_element_type=jnp.float32)          # (TILE, D) MXU
    s = jnp.sum(b * dv * xr_ref[...], axis=1, keepdims=True)                 # (TILE, 1)
    out_ref[...] = jax.nn.sigmoid(s)


# ----------------------------- pallas_call wrappers ---------------------------
def _fused_scores(idx, xT, lvT, gT, *, tile):
    e_pad = idx.shape[1]
    d_dim, n_nodes = xT.shape
    n_rel = lvT.shape[1]
    grid = (e_pad // tile,)

    # Per-tile working set: iota + mask + f32 one-hot (~3x), resident tables (double-buffered),
    # streamed idx/out buffers, (D, 2*TE)-sized intermediates.
    onehot_bytes = 4 * 3 * (2 * n_nodes + n_rel) * tile
    resident_bytes = 4 * 2 * d_dim * (n_nodes + n_rel + d_dim)
    stream_bytes = 4 * 2 * (3 * tile + tile) + 4 * 8 * d_dim * tile
    vmem_limit = int(min(48 << 20,
                         max(24 << 20, 2 * (onehot_bytes + resident_bytes + stream_bytes))))

    return pl.pallas_call(
        _dedicom_fused_kernel,
        out_shape=jax.ShapeDtypeStruct((1, e_pad), jnp.float32),
        grid_spec=pltpu.PrefetchScalarGridSpec(
            num_scalar_prefetch=0,
            grid=grid,
            in_specs=[
                pl.BlockSpec((3, tile), lambda i: (0, i)),          # packed edge ids
                pl.BlockSpec((d_dim, n_nodes), lambda i: (0, 0)),   # x^T          (resident)
                pl.BlockSpec((d_dim, n_rel), lambda i: (0, 0)),     # local_var^T  (resident)
                pl.BlockSpec((d_dim, d_dim), lambda i: (0, 0)),     # G^T          (resident)
            ],
            out_specs=pl.BlockSpec((1, tile), lambda i: (0, i)),    # lane-dense output
        ),
        compiler_params=pltpu.CompilerParams(
            dimension_semantics=("parallel",),
            vmem_limit_bytes=vmem_limit),
    )(idx, xT, lvT, gT)


def _streaming_scores(xl, xr, dv, g, *, tile):
    e_pad, d_dim = xl.shape
    grid = (e_pad // tile,)
    d_pad = _round_up(max(d_dim, 1), 128)   # VMEM lane padding of (TILE, D) blocks
    vmem_limit = int(min(48 << 20, max(24 << 20, 4 * 12 * tile * d_pad)))

    edge_spec = pl.BlockSpec((tile, d_dim), lambda i: (i, 0))
    return pl.pallas_call(
        _dedicom_streaming_kernel,
        out_shape=jax.ShapeDtypeStruct((e_pad, 1), jnp.float32),
        grid_spec=pltpu.PrefetchScalarGridSpec(
            num_scalar_prefetch=0,
            grid=grid,
            in_specs=[
                edge_spec, edge_spec, edge_spec,
                pl.BlockSpec((d_dim, d_dim), lambda i: (0, 0)),
            ],
            out_specs=pl.BlockSpec((tile, 1), lambda i: (i, 0)),
        ),
        compiler_params=pltpu.CompilerParams(
            dimension_semantics=("parallel",),
            vmem_limit_bytes=vmem_limit),
    )(xl, xr, dv, g)


# ------------------------------- forward --------------------------------------
@functools.partial(jax.jit, static_argnames=("tile", "force_path"))
def dedicom_decoder_forward(x, edge_index, edge_type, global_interaction,
                            local_variation, *, tile=2048, force_path=None):
    """JAX/Pallas equivalent of DEDICOMDecoder.forward.

    Returns (E,) float32 scores grouped by relation id (stable within a relation),
    matching the torch.cat-over-relations ordering of the reference module.
    """
    n_nodes, d_dim = x.shape
    n_rel = local_variation.shape[0]

    # --- glue: group edges by relation id (stable), as the per-relation cat does ---
    order = jnp.argsort(edge_type, stable=True)
    left = edge_index[0][order].astype(jnp.int32)
    right = edge_index[1][order].astype(jnp.int32)
    etype = edge_type[order].astype(jnp.int32)
    e = etype.shape[0]

    if force_path is None:
        fuse = (n_nodes <= _FUSED_MAX_NODES) and (n_rel <= _FUSED_MAX_RELATIONS)
    else:
        fuse = (force_path == "fused")

    if fuse:
        # Stream only int32 ids; gather rows inside the kernel (tables are VMEM-resident).
        tile_f = max(128, min(_FUSED_TILE, _round_up(e, 128)))
        e_pad = _round_up(e, tile_f)
        idx = jnp.stack([etype, left, right], axis=0)            # (3, E)
        idx = jnp.pad(idx, ((0, 0), (0, e_pad - e)))
        xT = jnp.transpose(x).astype(jnp.float32)                # (D, N)  small by gate
        lvT = jnp.transpose(local_variation).astype(jnp.float32)  # (D, R)
        gT = jnp.transpose(global_interaction).astype(jnp.float32)
        out = _fused_scores(idx, xT, lvT, gT, tile=tile_f)
        # Padded tail edges produce sigmoid of a valid-but-meaningless score; sliced off here.
        return out[0, :e]

    # General path: gather outside the kernel, directly in the natural (E, D) row layout
    # (no transpose pass), and stream big (TILE, D) slabs.
    tile_req = _round_up(max(int(tile), 128), 128)
    d_pad = _round_up(max(d_dim, 1), 128)
    tile_cap = max(128, ((2048 * 128 // d_pad) // 128) * 128)    # keep VMEM bounded for big D
    tile_s = min(tile_req, tile_cap, _round_up(e, 128))
    e_pad = _round_up(e, tile_s)
    pad = e_pad - e

    # Pad the (cheap) int32 indices BEFORE gathering so no extra pad pass over (E, D) data.
    left_p = jnp.pad(left, (0, pad))
    right_p = jnp.pad(right, (0, pad))
    etype_p = jnp.pad(etype, (0, pad))

    xf = x.astype(jnp.float32)
    xl = xf[left_p]                                              # (E_pad, D)
    xr = xf[right_p]                                             # (E_pad, D)
    dv = local_variation.astype(jnp.float32)[etype_p]            # (E_pad, D)
    g = global_interaction.astype(jnp.float32)

    out = _streaming_scores(xl, xr, dv, g, tile=tile_s)          # (E_pad, 1)
    return out[:e, 0]


# --------------------------- parameter init ----------------------------------
def init_glorot(key, in_channels, out_channels, dtype=jnp.float32):
    init_range = jnp.sqrt(6.0 / (in_channels + out_channels))
    return jax.random.uniform(
        key, (in_channels, out_channels), dtype=dtype,
        minval=-init_range, maxval=init_range)


def make_params(key, num_relations, input_dim):
    k_g, k_l = jax.random.split(key)
    global_interaction = init_glorot(k_g, input_dim, input_dim)
    keys = jax.random.split(k_l, num_relations)
    local_variation = jnp.stack(
        [init_glorot(k, input_dim, 1).reshape(-1) for k in keys], axis=0)
    return global_interaction, local_variation


# ------------------------------ reference ------------------------------------
def dedicom_decoder_ref(x, edge_index, edge_type, g, local_variation):
    """Pure-JAX reference mirroring the PyTorch per-relation loop (vectorized)."""
    order = jnp.argsort(edge_type, stable=True)
    left = edge_index[0][order]
    right = edge_index[1][order]
    d = local_variation[edge_type[order]]
    xl = x[left]
    xr = x[right]
    p = ((xl * d) @ g) * d
    return jax.nn.sigmoid(jnp.sum(p * xr, axis=1))


# --------------------------------- main ---------------------------------------
if __name__ == "__main__":
    num_relations = 8
    input_dim = 32
    num_nodes = 16
    num_edges = 64

    key = jax.random.PRNGKey(0)
    k_params, k_x, k_left, k_right, k_type = jax.random.split(key, 5)

    global_interaction, local_variation = make_params(
        k_params, num_relations, input_dim)

    x = jax.random.normal(k_x, (num_nodes, input_dim), dtype=jnp.float32)
    left = jax.random.randint(k_left, (num_edges,), 0, num_nodes, dtype=jnp.int32)
    right = jax.random.randint(k_right, (num_edges,), 0, num_nodes, dtype=jnp.int32)
    edge_index = jnp.stack([left, right], axis=0)               # (2, E)
    edge_type = jax.random.randint(k_type, (num_edges,), 0, num_relations,
                                   dtype=jnp.int32)

    ref = dedicom_decoder_ref(
        x, edge_index, edge_type, global_interaction, local_variation)

    out_fused = jax.block_until_ready(dedicom_decoder_forward(
        x, edge_index, edge_type, global_interaction, local_variation,
        force_path="fused"))
    out_stream = jax.block_until_ready(dedicom_decoder_forward(
        x, edge_index, edge_type, global_interaction, local_variation,
        force_path="streaming"))

    assert out_fused.shape == (num_edges,)
    assert out_stream.shape == (num_edges,)
    assert jnp.allclose(out_fused, ref, atol=1e-5, rtol=1e-5), \
        "fused path mismatch vs reference"
    assert jnp.allclose(out_stream, ref, atol=1e-5, rtol=1e-5), \
        "streaming path mismatch vs reference"
    print("KERNEL_OK")
</pallas_src>

<mosaic_0001>
module attributes {stable_mosaic.version = 11 : i64} {
  func.func @_dedicom_fused_kernel(%arg0: i32, %arg1: memref<3x128xi32, #tpu.memory_space<vmem>>, %arg2: memref<32x16xf32, #tpu.memory_space<vmem>>, %arg3: memref<32x8xf32, #tpu.memory_space<vmem>>, %arg4: memref<32x32xf32, #tpu.memory_space<vmem>>, %arg5: memref<1x128xf32, #tpu.memory_space<vmem>>) attributes {dimension_semantics = [#tpu.dimension_semantics<parallel>], iteration_bounds = array<i64: 1>, scalar_prefetch = 0 : i64, scratch_operands = 0 : i64, tpu.core_type = #tpu.core_type<tc>, window_params = [{transform_indices = @transform_0, window_bounds = array<i64: 3, 128>}, {pipeline_mode = #tpu.pipeline_mode<synchronous>, transform_indices = @transform_1, window_bounds = array<i64: 32, 16>}, {pipeline_mode = #tpu.pipeline_mode<synchronous>, transform_indices = @transform_2, window_bounds = array<i64: 32, 8>}, {pipeline_mode = #tpu.pipeline_mode<synchronous>, transform_indices = @transform_3, window_bounds = array<i64: 32, 32>}, {transform_indices = @transform_4, window_bounds = array<i64: 1, 128>}]} {
    %c0 = arith.constant 0 : index
    %c0_0 = arith.constant 0 : index
    %0 = vector.load %arg1[%c0, %c0_0] : memref<3x128xi32, #tpu.memory_space<vmem>>, vector<3x128xi32>
    %1 = vector.extract_strided_slice %0 {offsets = [0, 0], sizes = [1, 128], strides = [1, 1]} : vector<3x128xi32> to vector<1x128xi32>
    %2 = vector.extract_strided_slice %0 {offsets = [1, 0], sizes = [1, 128], strides = [1, 1]} : vector<3x128xi32> to vector<1x128xi32>
    %3 = vector.extract_strided_slice %0 {offsets = [2, 0], sizes = [1, 128], strides = [1, 1]} : vector<3x128xi32> to vector<1x128xi32>
    %4 = tpu.concatenate %2, %3 in 1 : vector<1x128xi32>, vector<1x128xi32> -> vector<1x256xi32>
    %5 = tpu.iota {dimensions = array<i32: 0>} : vector<16x256xi32>
    %6 = vector.broadcast %4 : vector<1x256xi32> to vector<16x256xi32>
    %7 = arith.cmpi eq, %5, %6 : vector<16x256xi32>
    %8 = arith.extui %7 : vector<16x256xi1> to vector<16x256xi32>
    %9 = arith.sitofp %8 : vector<16x256xi32> to vector<16x256xf32>
    %10 = tpu.iota {dimensions = array<i32: 0>} : vector<8x128xi32>
    %11 = vector.broadcast %1 : vector<1x128xi32> to vector<8x128xi32>
    %12 = arith.cmpi eq, %10, %11 : vector<8x128xi32>
    %13 = arith.extui %12 : vector<8x128xi1> to vector<8x128xi32>
    %14 = arith.sitofp %13 : vector<8x128xi32> to vector<8x128xf32>
    %c0_1 = arith.constant 0 : index
    %c0_2 = arith.constant 0 : index
    %15 = vector.load %arg2[%c0_1, %c0_2] : memref<32x16xf32, #tpu.memory_space<vmem>>, vector<32x16xf32>
    %cst = arith.constant dense<0.000000e+00> : vector<32x256xf32>
    %16 = tpu.matmul %15, %9, %cst {dimension_numbers = #tpu.dot_dimension_numbers<[1], [0], [0], [1], [0, 0, 1, 1], [], []>} : vector<32x16xf32>, vector<16x256xf32>, vector<32x256xf32> -> vector<32x256xf32>
    %c0_3 = arith.constant 0 : index
    %c0_4 = arith.constant 0 : index
    %17 = vector.load %arg3[%c0_3, %c0_4] : memref<32x8xf32, #tpu.memory_space<vmem>>, vector<32x8xf32>
    %cst_5 = arith.constant dense<0.000000e+00> : vector<32x128xf32>
    %18 = tpu.matmul %17, %14, %cst_5 {dimension_numbers = #tpu.dot_dimension_numbers<[1], [0], [0], [1], [0, 0, 1, 1], [], []>} : vector<32x8xf32>, vector<8x128xf32>, vector<32x128xf32> -> vector<32x128xf32>
    %19 = vector.extract_strided_slice %16 {offsets = [0, 0], sizes = [32, 128], strides = [1, 1]} : vector<32x256xf32> to vector<32x128xf32>
    %20 = vector.extract_strided_slice %16 {offsets = [0, 128], sizes = [32, 128], strides = [1, 1]} : vector<32x256xf32> to vector<32x128xf32>
    %21 = arith.mulf %19, %18 : vector<32x128xf32>
    %c0_6 = arith.constant 0 : index
    %c0_7 = arith.constant 0 : index
    %22 = vector.load %arg4[%c0_6, %c0_7] : memref<32x32xf32, #tpu.memory_space<vmem>>, vector<32x32xf32>
    %cst_8 = arith.constant dense<0.000000e+00> : vector<32x128xf32>
    %23 = tpu.matmul %22, %21, %cst_8 {dimension_numbers = #tpu.dot_dimension_numbers<[1], [0], [0], [1], [0, 0, 1, 1], [], []>} : vector<32x32xf32>, vector<32x128xf32>, vector<32x128xf32> -> vector<32x128xf32>
    %24 = arith.mulf %23, %18 : vector<32x128xf32>
    %25 = arith.mulf %24, %20 : vector<32x128xf32>
    %cst_9 = arith.constant dense<0.000000e+00> : vector<128xf32>
    %26 = vector.multi_reduction <add>, %25, %cst_9 [0] : vector<32x128xf32> to vector<128xf32>
    %27 = vector.shape_cast %26 : vector<128xf32> to vector<1x128xf32>
    %28 = arith.negf %27 : vector<1x128xf32>
    %29 = math.exp %28 : vector<1x128xf32>
    %cst_10 = arith.constant 1.000000e+00 : f32
    %30 = vector.broadcast %cst_10 : f32 to vector<1x128xf32>
    %31 = arith.addf %30, %29 : vector<1x128xf32>
    %32 = arith.divf %30, %31 : vector<1x128xf32>
    %c0_11 = arith.constant 0 : index
    %c0_12 = arith.constant 0 : index
    %33 = vector.load %arg5[%c0_11, %c0_12] : memref<1x128xf32, #tpu.memory_space<vmem>>, vector<1x128xf32>
    tpu.vector_store %arg5[%c0_11, %c0_12], %32 {strides = array<i32>} : memref<1x128xf32, #tpu.memory_space<vmem>>, vector<1x128xf32>,
    return
  }
  func.func @transform_0(%arg0: i32) -> (i32, i32) {
    %c0_i32 = arith.constant 0 : i32
    %c0_i32_0 = arith.constant 0 : i32
    return %c0_i32, %arg0 : i32, i32
  }
  func.func @transform_1(%arg0: i32) -> (i32, i32) {
    %c0_i32 = arith.constant 0 : i32
    %c0_i32_0 = arith.constant 0 : i32
    %c0_i32_1 = arith.constant 0 : i32
    return %c0_i32, %c0_i32_0 : i32, i32
  }
  func.func @transform_2(%arg0: i32) -> (i32, i32) {
    %c0_i32 = arith.constant 0 : i32
    %c0_i32_0 = arith.constant 0 : i32
    %c0_i32_1 = arith.constant 0 : i32
    return %c0_i32, %c0_i32_0 : i32, i32
  }
  func.func @transform_3(%arg0: i32) -> (i32, i32) {
    %c0_i32 = arith.constant 0 : i32
    %c0_i32_0 = arith.constant 0 : i32
    %c0_i32_1 = arith.constant 0 : i32
    return %c0_i32, %c0_i32_0 : i32, i32
  }
  func.func @transform_4(%arg0: i32) -> (i32, i32) {
    %c0_i32 = arith.constant 0 : i32
    %c0_i32_0 = arith.constant 0 : i32
    return %c0_i32, %arg0 : i32, i32
  }
}

</mosaic_0001>

<bundles_post_ra>
// kernel: dedicom_decoder_forward.1
= control target key start
LH: loop header
LB: loop body
LE: loop exit
PB: predicated region body
PF: predicated region fallthrough
CT: control target
= control target key end

     0   :  { %v19_v0 = vlaneseq  ;;  %vm159_vm0 = vcmask 64512   ;;  %v468_v5 = vmov 0.0   ;;  %v469_v13 = vmov 1.0|1.0   ;;  %s546_s0 = inlined_call_operand.vmem [shape: s32[3,128], index: 0, kind: input, shape index: {}]   ;;  %s547_s2 = inlined_call_operand.vmem [shape: f32[32,8], index: 2, kind: input, shape index: {}]   ;;  %s548_s1 = inlined_call_operand.vmem [shape: f32[32,16], index: 1, kind: input, shape index: {}]   ;;  %s549_s3 = inlined_call_operand.vmem [shape: f32[32,32], index: 3, kind: input, shape index: {}]   ;;  %s550_s4 = inlined_call_operand.vmem [shape: f32[1,128], index: 4, kind: output, shape index: {}]  }
   0x1   :  { %v17_v1 = vld [vmem:[%s546_s0] sm:$0x7]  ;;  %130 = vmatprep.mubr.f32.mxu0 %v468_v5  ;;  %v156_v12 = vld [vmem:[%s547_s2 + $0x8] sm:$0xff]  ;;  %v470_v14 = vmov 1.0   ;;  %v157_v15 = vld [vmem:[%s547_s2 + $0x10] sm:$0xff]  ;;  %vm53_vm8 = vcmask 130048  }
   0x2   :  { %v155_v2 = vld [vmem:[%s547_s2] sm:$0xff]  ;;  %v18_v3 = vrot.slane %v17_v1, 1  ;;  %v20_v4 = vshrl.u32 %v19_v0, 7  ;;  %v158_v17 = vld [vmem:[%s547_s2 + $0x18] sm:$0xff]  ;;  %v50_v18 = vld [vmem:[%s548_s1 + $0x8] sm:$0xff]  ;;  %vm265_vm9 = vcmask 261120  }
   0x3   :  { %429 = vmatprep.mubr.msk.f32.mxu1 %vm159_vm0, %v155_v2  ;;  %v49_v16 = vld [vmem:[%s548_s1] sm:$0xff]  ;;  %v51_v19 = vld [vmem:[%s548_s1 + $0x10] sm:$0xff]  ;;  %v52_v20 = vld [vmem:[%s548_s1 + $0x18] sm:$0xff] }
   0x4   :  { %v21_v6 = vadd.s32 8, %v20_v4  ;;  %v24_v7 = vsub.s32 1, %v20_v4  ;;  %v44_v8 = vsub.s32 0, %v20_v4  ;;  %v261_v21 = vld [vmem:[%s549_s3] sm:$0xff]  ;;  %v262_v40 = vld [vmem:[%s549_s3 + $0x8] sm:$0xff]  ;;  %v263_v41 = vld [vmem:[%s549_s3 + $0x10] sm:$0xff] }
   0x5   :  { %v264_v42 = vld [vmem:[%s549_s3 + $0x18] sm:$0xff] }
   0x6   :  { %v29_v9 = vrot.slane %v18_v3, %v24_v7  ;;  %v25_v10 = vrot.slane %v17_v1, %v24_v7  ;;  %v45_v11 = vrot.slane %v17_v1, %v44_v8 }
   0x8   :  { %vm31_vm1 = vcmp.eq.s32.totalorder %v20_v4, %v29_v9  ;;  %vm33_vm2 = vcmp.eq.s32.totalorder %v21_v6, %v29_v9  ;;  %vm30_vm3 = vcmp.eq.s32.totalorder %v20_v4, %v25_v10  ;;  %vm32_vm4 = vcmp.eq.s32.totalorder %v21_v6, %v25_v10 }
   0x9   :  { %vm449_vm5 = vmpackc.low %vm33_vm2, %vm31_vm1  ;;  %vm46_vm6 = vcmp.eq.s32.totalorder %v20_v4, %v45_v11 }
   0xa   :  { %450 = vmatprep.subr.msk.bf16.mxu0 %vm449_vm5, %v469_v13  ;;  %vm451_vm7 = vmpackc.low %vm32_vm4, %vm30_vm3  ;;  %427 = vmatprep.subr.msk.mxu1 %vm46_vm6, %v470_v14 }
   0xb   :  { %452 = vmatpush1.bf16.msk.msra.mxu0 %vm451_vm7, %v469_v13  ;;  %428 = vmatpush3.msk.msra.mxu1 %vm46_vm6, %v470_v14 }
   0xc   :  { %430 = vmatmul.mubr.msk.f32.vlgmr.msra.gmra.mrb[0].mxu1 %vm159_vm0, %v156_v12 }
   0xd   :  { %432 = vmatprep.mubr.msk.f32.mxu1 %vm159_vm0, %v157_v15 }
   0xe   :  { %400 = vmatmul.mubr.msk.f32.vlgmr.msra.gmra.mrb[0].mxu0 %vm53_vm8, %v49_v16 }
   0xf   :  { %136 = vmatprep.mubr.f32.mxu0 %v468_v5 }
  0x10   :  { %433 = vmatmul.mubr.msk.f32.gmra.mrb[2].mxu1 %vm159_vm0, %v158_v17 }
  0x11   :  { %443 = vmatprep.mubr.msk.f32.mxu1 %vm265_vm9, %v261_v21 }
  0x12   :  { %401 = vmatmul.mubr.msk.f32.gmra.mrb[2].mxu0 %vm53_vm8, %v50_v18 }
  0x13   :  { %142 = vmatprep.mubr.f32.mxu0 %v468_v5 }
  0x16   :  { %402 = vmatmul.mubr.msk.f32.gmra.mrb[4].mxu0 %vm53_vm8, %v51_v19 }
  0x17   :  { %148 = vmatprep.mubr.f32.mxu0 %v468_v5 }
  0x1a   :  { %403 = vmatmul.mubr.msk.f32.gmra.mrb[6].mxu0 %vm53_vm8, %v52_v20 }
  0xdf   :  { %v431_v22 = vpop.f32.mrb[0].mxu1 }
  0xe0   :  { %v238_v23 = vpop.f32.mrb[1].mxu1 }
  0xe1   :  { %v132_v24 = vpop.f32.mrb[0].mxu0 }
  0xe2   :  { %v257_v25 = vmul.f32 %v238_v23, %v132_v24  ;;  %v134_v26 = vpop.f32.mrb[1].mxu0 }
  0xe3   :  { %v434_v27 = vpop.f32.mrb[2].mxu1 }
  0xe4   :  { %v248_v28 = vpop.f32.mrb[3].mxu1 }
  0xe5   :  { %v138_v29 = vpop.f32.mrb[2].mxu0 }
  0xe6   :  { %v258_v30 = vmul.f32 %v431_v22, %v138_v29  ;;  %v140_v31 = vpop.f32.mrb[3].mxu0 }
  0xe8   :  { %v453_v32 = vpack.c.bf16 %v258_v30, %v257_v25 }
  0xe9   :  { %v144_v33 = vpop.f32.mrb[4].mxu0 }
  0xea   :  { %v259_v34 = vmul.f32 %v248_v28, %v144_v33  ;;  %v146_v35 = vpop.f32.mrb[5].mxu0  ;;  %454 = vmatprep.subr.bf16.mxu1 %v453_v32 }
  0xeb   :  { %456 = vmatpush3.bf16.msra.mxu1 %v453_v32 }
  0xed   :  { %v150_v36 = vpop.f32.mrb[6].mxu0 }
  0xee   :  { %v260_v37 = vmul.f32 %v434_v27, %v150_v36  ;;  %v152_v38 = vpop.f32.mrb[7].mxu0 }
  0xf0   :  { %v457_v39 = vpack.c.bf16 %v260_v37, %v259_v34 }
  0xf2   :  { %458 = vmatprep.subr.bf16.mxu1 %v457_v39 }
  0xf3   :  { %460 = vmatpush3.bf16.msra.mxu1 %v457_v39 }
  0xf6   :  { %444 = vmatmul.mubr.msk.f32.vlgmr.msra.gmra.mrb[4].mxu1 %vm265_vm9, %v262_v40 }
  0xf7   :  { %446 = vmatprep.mubr.msk.f32.mxu1 %vm265_vm9, %v263_v41 }
  0xfa   :  { %447 = vmatmul.mubr.msk.f32.gmra.mrb[6].mxu1 %vm265_vm9, %v264_v42 }
 0x1c9   :  { %v445_v43 = vpop.f32.mrb[4].mxu1 }
 0x1ca   :  { %v364_v44 = vmul.f32 %v445_v43, %v431_v22  ;;  %v344_v45 = vpop.f32.mrb[5].mxu1 }
 0x1cb   :  { %v363_v46 = vmul.f32 %v344_v45, %v238_v23 }
 0x1cc   :  { %v368_v47 = vmul.f32 %v364_v44, %v140_v31 }
 0x1cd   :  { %v367_v48 = vmul.f32 %v363_v46, %v134_v26  ;;  %v448_v49 = vpop.f32.mrb[6].mxu1 }
 0x1ce   :  { %v366_v50 = vmul.f32 %v448_v49, %v434_v27  ;;  %v354_v51 = vpop.f32.mrb[7].mxu1 }
 0x1cf   :  { %v371_v52 = vadd.f32 %v368_v47, %v367_v48  ;;  %v365_v53 = vmul.f32 %v354_v51, %v248_v28 }
 0x1d0   :  { %v370_v54 = vmul.f32 %v366_v50, %v152_v38 }
 0x1d1   :  { %v369_v55 = vmul.f32 %v365_v53, %v146_v35 }
 0x1d3   :  { %v372_v56 = vadd.f32 %v371_v52, %v369_v55 }
 0x1d5   :  { %v373_v57 = vadd.f32 %v372_v56, %v370_v54 }
 0x1d7   :  { %v374_v58 = vrot.slane %v373_v57, 4 }
 0x1d9   :  { %v375_v59 = vadd.f32 %v374_v58, %v373_v57 }
 0x1db   :  { %v376_v60 = vrot.slane %v375_v59, 2 }
 0x1dd   :  { %v377_v61 = vadd.f32 %v376_v60, %v375_v59 }
 0x1df   :  { %v378_v62 = vrot.slane %v377_v61, 1 }
 0x1e1   :  { %v379_v63 = vadd.f32 %v378_v62, %v377_v61 }
 0x1e3   :  { %v413_v0 = vmul.f32 -1.442695, %v379_v63 }
 0x1e5   :  { %464 = vpow2.f32 %v413_v0 }
 0x1ef   :  { %v465_v1 = vpop.eup %464 }
 0x1f0   :  { %v383_v2 = vadd.f32 1.0, %v465_v1 }
 0x1f2   :  { %466 = vrcp.f32 %v383_v2 }
 0x1fc   :  { %v467_v3 = vpop.eup %466 }
 0x1fd   :  { %386 = vst [vmem:[%s550_s4] sm:$0x1] %v467_v3 }

</bundles_post_ra>
